<compile_context>
chip_gen: v7x
topology: tpu7x:2x2x1
jax: 0.10.0
libtpu: 0.0.40
codegen_flags: <defaults>
</compile_context>

<pallas_src>
import jax
import jax.numpy as jnp
from jax.experimental import pallas as pl
from jax.experimental.pallas import tpu as pltpu

IN_DIM = 384
HID_DIM = 48
OUT_DIM = 384
HID_PAD = 128          # hidden 48 zero-padded to a full lane width (exact: pads are zero)
MAX_TM = 512           # max node rows per grid step in the tiled path
FUSED_MAX_NODES = 1024  # below this, everything (A bf16 + X + H) trivially fits VMEM


def _round_up(x, m):
    return (x + m - 1) // m * m


def _vmem_budget_bytes():
    """Per-generation VMEM budget: ~3/4 of physical, clamped to [32, 112] MiB."""
    cap = 64 * 1024 * 1024
    try:
        info = pltpu.get_tpu_info()
        cap = int(getattr(info, "vmem_capacity_bytes", cap)) or cap
    except Exception:
        pass  # fall back to the v7x-safe 64 MiB assumption
    return max(32 * 1024 * 1024, min(cap * 3 // 4, 112 * 1024 * 1024))


def _tiled_vmem_bytes(tm, n_pad):
    """Worst-pass VMEM footprint of the tiled path (pass 2)."""
    a_slab = 2 * tm * n_pad * 2          # double-buffered bf16 A row slab
    resident = 2 * n_pad * HID_PAD * 2   # resident XW / H (double-buffered by default)
    out_slab = 2 * tm * OUT_DIM * 4      # double-buffered f32 output slab
    weights = 2 * (IN_DIM + OUT_DIM) * HID_PAD * 2
    return a_slab + resident + out_slab + weights + (2 << 20)  # + internal scratch slack


# ---------------- kernels ----------------

def fused_kernel(a_ref, x_ref, w1_ref, b1_ref, w2_ref, b2_ref, o_ref):
    # Whole graph resident in VMEM: A read once, XW/H never leave VMEM.
    a = a_ref[...]
    xw = jnp.dot(x_ref[...], w1_ref[...], preferred_element_type=jnp.float32)
    h = jnp.dot(a, xw.astype(jnp.bfloat16), preferred_element_type=jnp.float32)
    h = jnp.maximum(h + b1_ref[...], 0.0).astype(jnp.bfloat16)
    ah = jnp.dot(a, h, preferred_element_type=jnp.float32)          # 128-wide contraction
    out = jnp.dot(ah.astype(jnp.bfloat16), w2_ref[...],
                  preferred_element_type=jnp.float32)
    o_ref[...] = (out + b2_ref[...]).astype(o_ref.dtype)


def project_kernel(x_ref, w1_ref, xw_ref):
    # XW_blk = X_blk @ W1
    xw = jnp.dot(x_ref[...], w1_ref[...], preferred_element_type=jnp.float32)
    xw_ref[...] = xw.astype(xw_ref.dtype)


def agg1_kernel(a_ref, xw_ref, b1_ref, h_ref):
    # H_blk = relu(A_blk @ XW + b1)   (128-lane bf16 output; W2 deferred to pass 2)
    h = jnp.dot(a_ref[...], xw_ref[...], preferred_element_type=jnp.float32)
    h_ref[...] = jnp.maximum(h + b1_ref[...], 0.0).astype(h_ref.dtype)


def agg2_kernel(a_ref, h_ref, w2_ref, b2_ref, o_ref):
    # OUT_blk = (A_blk @ H) @ W2 + b2   (associativity: == A_blk @ (H @ W2) + b2)
    ah = jnp.dot(a_ref[...], h_ref[...], preferred_element_type=jnp.float32)
    out = jnp.dot(ah.astype(w2_ref.dtype), w2_ref[...],
                  preferred_element_type=jnp.float32)
    o_ref[...] = (out + b2_ref[...]).astype(o_ref.dtype)


# ---------------- wrapper ----------------

def gcn_forward(a_norm, x, w1, b1, w2, b2, *, force_tiled=False):
    n = x.shape[0]
    vmem_limit = _vmem_budget_bytes()

    # Padded bf16 parameters (zero lanes/rows contribute nothing -> exact).
    w1p = jnp.zeros((IN_DIM, HID_PAD), jnp.bfloat16).at[:, :HID_DIM].set(
        w1.astype(jnp.bfloat16))
    w2p = jnp.zeros((HID_PAD, OUT_DIM), jnp.bfloat16).at[:HID_DIM, :].set(
        w2.astype(jnp.bfloat16))
    b1p = jnp.zeros((1, HID_PAD), jnp.float32).at[:, :HID_DIM].set(b1)

    def pad_bf16(arr, rows, cols):
        # Pad + cast in one shot: no padded f32 copy of the N^2 matrix in HBM.
        return jnp.zeros((rows, cols), jnp.bfloat16).at[:arr.shape[0], :arr.shape[1]].set(
            arr.astype(jnp.bfloat16))

    # ---- fused single-kernel path (A read from HBM exactly once) ----
    if (not force_tiled) and _round_up(n, 16) <= FUSED_MAX_NODES:
        n_pad = _round_up(n, 16)
        a_bf = pad_bf16(a_norm, n_pad, n_pad)
        x_bf = pad_bf16(x, n_pad, IN_DIM)
        flops = 2 * n_pad * (IN_DIM * HID_PAD + 2 * n_pad * HID_PAD + HID_PAD * OUT_DIM)
        bytes_accessed = (2 * n_pad * n_pad + 2 * n_pad * IN_DIM
                          + 2 * (IN_DIM + OUT_DIM) * HID_PAD + 4 * n_pad * OUT_DIM)
        out = pl.pallas_call(
            fused_kernel,
            out_shape=jax.ShapeDtypeStruct((n_pad, OUT_DIM), jnp.float32),
            compiler_params=pltpu.CompilerParams(vmem_limit_bytes=vmem_limit),
            cost_estimate=pl.CostEstimate(flops=flops, transcendentals=0,
                                          bytes_accessed=bytes_accessed),
        )(a_bf, x_bf, w1p, b1p, w2p, b2)
        return out[:n]

    # ---- tiled multi-pass path (large graphs / forced) ----
    tm = min(MAX_TM, _round_up(n, 16))
    while tm > 16 and _tiled_vmem_bytes(tm, _round_up(n, tm)) > vmem_limit:
        tm = max(16, (tm // 2) // 16 * 16)
    n_pad = _round_up(n, tm)
    grid = (n_pad // tm,)

    a_bf = pad_bf16(a_norm, n_pad, n_pad)
    x_bf = pad_bf16(x, n_pad, IN_DIM)

    cparams = pltpu.CompilerParams(
        dimension_semantics=("parallel",),   # independent row blocks; megacore on v7x
        vmem_limit_bytes=vmem_limit,
    )
    row = lambda c: pl.BlockSpec((tm, c), lambda i: (i, 0))       # row-tiled arrays
    res = lambda r, c: pl.BlockSpec((r, c), lambda i: (0, 0))     # resident (constant block)

    # pass 0: XW = X @ W1   (projection hoisted out of the aggregation loop)
    xw = pl.pallas_call(
        project_kernel,
        out_shape=jax.ShapeDtypeStruct((n_pad, HID_PAD), jnp.bfloat16),
        grid=grid,
        in_specs=[row(IN_DIM), res(IN_DIM, HID_PAD)],
        out_specs=row(HID_PAD),
        compiler_params=cparams,
    )(x_bf, w1p)

    # pass 1: H = relu(A @ XW + b1)   (bf16, 128 lanes; W2 deferred)
    h = pl.pallas_call(
        agg1_kernel,
        out_shape=jax.ShapeDtypeStruct((n_pad, HID_PAD), jnp.bfloat16),
        grid=grid,
        in_specs=[row(n_pad), res(n_pad, HID_PAD), res(1, HID_PAD)],
        out_specs=row(HID_PAD),
        compiler_params=cparams,
        cost_estimate=pl.CostEstimate(
            flops=2 * n_pad * n_pad * HID_PAD, transcendentals=0,
            bytes_accessed=2 * n_pad * n_pad + 4 * n_pad * HID_PAD),
    )(a_bf, xw, b1p)

    # pass 2: OUT = (A @ H) @ W2 + b2   (128-wide contraction against A)
    out = pl.pallas_call(
        agg2_kernel,
        out_shape=jax.ShapeDtypeStruct((n_pad, OUT_DIM), jnp.float32),
        grid=grid,
        in_specs=[row(n_pad), res(n_pad, HID_PAD), res(HID_PAD, OUT_DIM), res(1, OUT_DIM)],
        out_specs=row(OUT_DIM),
        compiler_params=cparams,
        cost_estimate=pl.CostEstimate(
            flops=2 * n_pad * (n_pad * HID_PAD + HID_PAD * OUT_DIM), transcendentals=0,
            bytes_accessed=2 * n_pad * n_pad + 2 * n_pad * HID_PAD + 4 * n_pad * OUT_DIM),
    )(a_bf, h, w2p, b2)

    return out[:n]


# ---------------- glue / reference ----------------

def build_norm_adj(edge_index, num_nodes):
    """Dense D_hat^{-1/2} (A + I) D_hat^{-1/2} from a [2, E] edge_index (like PyG GCNConv)."""
    src, dst = edge_index[0], edge_index[1]
    a = jnp.zeros((num_nodes, num_nodes), jnp.float32)
    a = a.at[src, dst].add(1.0)
    a = a + jnp.eye(num_nodes, dtype=jnp.float32)  # self-loops
    deg = jnp.sum(a, axis=1)
    d_inv_sqrt = jnp.where(deg > 0, 1.0 / jnp.sqrt(deg), 0.0)
    return a * d_inv_sqrt[:, None] * d_inv_sqrt[None, :]


def glorot(key, shape):
    fan_in, fan_out = shape
    limit = jnp.sqrt(6.0 / (fan_in + fan_out))
    return jax.random.uniform(key, shape, jnp.float32, -limit, limit)


def reference_forward(a_norm, x, w1, b1, w2, b2):
    h = a_norm @ (x @ w1) + b1
    h = jnp.maximum(h, 0.0)
    return a_norm @ (h @ w2) + b2


if __name__ == "__main__":
    key = jax.random.PRNGKey(0)
    k_x, k_w1, k_w2 = jax.random.split(key, 3)

    num_nodes = 16  # small node count; feature dims fixed by the module (384 -> 48 -> 384)

    # Deterministic synthetic graph: bidirectional ring.
    src = jnp.arange(num_nodes, dtype=jnp.int32)
    dst = (src + 1) % num_nodes
    edge_index = jnp.stack(
        [jnp.concatenate([src, dst]), jnp.concatenate([dst, src])], axis=0
    )

    x = jax.random.normal(k_x, (num_nodes, IN_DIM), jnp.float32)

    # GCNConv init: glorot weights, zero bias.
    w1 = glorot(k_w1, (IN_DIM, HID_DIM))
    b1 = jnp.zeros((1, HID_DIM), jnp.float32)
    w2 = glorot(k_w2, (HID_DIM, OUT_DIM))
    b2 = jnp.zeros((1, OUT_DIM), jnp.float32)

    a_norm = build_norm_adj(edge_index, num_nodes)
    ref = reference_forward(a_norm, x, w1, b1, w2, b2)

    # Fused single-kernel path (default for small/medium graphs).
    out_fused = jax.block_until_ready(
        jax.jit(gcn_forward)(a_norm, x, w1, b1, w2, b2))
    # Tiled multi-pass path (used for large graphs) — exercised here for correctness.
    out_tiled = jax.block_until_ready(
        jax.jit(lambda *a: gcn_forward(*a, force_tiled=True))(a_norm, x, w1, b1, w2, b2))

    for out in (out_fused, out_tiled):
        assert out.shape == (num_nodes, OUT_DIM)
        # bf16 MXU inputs with f32 accumulation: compare with a relative-error bound.
        rel_err = jnp.max(jnp.abs(out - ref)) / (jnp.max(jnp.abs(ref)) + 1e-6)
        assert rel_err < 2e-2, f"relative error too large: {rel_err}"

    print("KERNEL_OK")
</pallas_src>

<mosaic_0001>
module attributes {stable_mosaic.version = 11 : i64} {
  func.func @fused_kernel(%arg0: memref<16x16xbf16, #tpu.memory_space<vmem>>, %arg1: memref<16x384xbf16, #tpu.memory_space<vmem>>, %arg2: memref<384x128xbf16, #tpu.memory_space<vmem>>, %arg3: memref<1x128xf32, #tpu.memory_space<vmem>>, %arg4: memref<128x384xbf16, #tpu.memory_space<vmem>>, %arg5: memref<1x384xf32, #tpu.memory_space<vmem>>, %arg6: memref<16x384xf32, #tpu.memory_space<vmem>>) attributes {dimension_semantics = [], scalar_prefetch = 0 : i64, scratch_operands = 0 : i64, tpu.core_type = #tpu.core_type<tc>} {
    %c0 = arith.constant 0 : index
    %c0_0 = arith.constant 0 : index
    %0 = vector.load %arg0[%c0, %c0_0] : memref<16x16xbf16, #tpu.memory_space<vmem>>, vector<16x16xbf16>
    %c0_1 = arith.constant 0 : index
    %c0_2 = arith.constant 0 : index
    %1 = vector.load %arg1[%c0_1, %c0_2] : memref<16x384xbf16, #tpu.memory_space<vmem>>, vector<16x384xbf16>
    %c0_3 = arith.constant 0 : index
    %c0_4 = arith.constant 0 : index
    %2 = vector.load %arg2[%c0_3, %c0_4] : memref<384x128xbf16, #tpu.memory_space<vmem>>, vector<384x128xbf16>
    %cst = arith.constant dense<0.000000e+00> : vector<16x128xf32>
    %3 = tpu.matmul %1, %2, %cst {dimension_numbers = #tpu.dot_dimension_numbers<[1], [0], [0], [1], [0, 0, 1, 1], [], []>} : vector<16x384xbf16>, vector<384x128xbf16>, vector<16x128xf32> -> vector<16x128xf32>
    %4 = arith.truncf %3 : vector<16x128xf32> to vector<16x128xbf16>
    %cst_5 = arith.constant dense<0.000000e+00> : vector<16x128xf32>
    %5 = tpu.matmul %0, %4, %cst_5 {dimension_numbers = #tpu.dot_dimension_numbers<[1], [0], [0], [1], [0, 0, 1, 1], [], []>} : vector<16x16xbf16>, vector<16x128xbf16>, vector<16x128xf32> -> vector<16x128xf32>
    %c0_6 = arith.constant 0 : index
    %c0_7 = arith.constant 0 : index
    %6 = vector.load %arg3[%c0_6, %c0_7] : memref<1x128xf32, #tpu.memory_space<vmem>>, vector<1x128xf32>
    %7 = vector.broadcast %6 : vector<1x128xf32> to vector<16x128xf32>
    %8 = arith.addf %5, %7 : vector<16x128xf32>
    %cst_8 = arith.constant 0.000000e+00 : f32
    %9 = vector.broadcast %cst_8 : f32 to vector<16x128xf32>
    %10 = arith.maximumf %8, %9 : vector<16x128xf32>
    %11 = arith.truncf %10 : vector<16x128xf32> to vector<16x128xbf16>
    %cst_9 = arith.constant dense<0.000000e+00> : vector<16x128xf32>
    %12 = tpu.matmul %0, %11, %cst_9 {dimension_numbers = #tpu.dot_dimension_numbers<[1], [0], [0], [1], [0, 0, 1, 1], [], []>} : vector<16x16xbf16>, vector<16x128xbf16>, vector<16x128xf32> -> vector<16x128xf32>
    %13 = arith.truncf %12 : vector<16x128xf32> to vector<16x128xbf16>
    %c0_10 = arith.constant 0 : index
    %c0_11 = arith.constant 0 : index
    %14 = vector.load %arg4[%c0_10, %c0_11] : memref<128x384xbf16, #tpu.memory_space<vmem>>, vector<128x384xbf16>
    %cst_12 = arith.constant dense<0.000000e+00> : vector<16x384xf32>
    %15 = tpu.matmul %13, %14, %cst_12 {dimension_numbers = #tpu.dot_dimension_numbers<[1], [0], [0], [1], [0, 0, 1, 1], [], []>} : vector<16x128xbf16>, vector<128x384xbf16>, vector<16x384xf32> -> vector<16x384xf32>
    %c0_13 = arith.constant 0 : index
    %c0_14 = arith.constant 0 : index
    %16 = vector.load %arg5[%c0_13, %c0_14] : memref<1x384xf32, #tpu.memory_space<vmem>>, vector<1x384xf32>
    %17 = vector.broadcast %16 : vector<1x384xf32> to vector<16x384xf32>
    %18 = arith.addf %15, %17 : vector<16x384xf32>
    %c0_15 = arith.constant 0 : index
    %c0_16 = arith.constant 0 : index
    %19 = vector.load %arg6[%c0_15, %c0_16] : memref<16x384xf32, #tpu.memory_space<vmem>>, vector<16x384xf32>
    tpu.vector_store %arg6[%c0_15, %c0_16], %18 {strides = array<i32>} : memref<16x384xf32, #tpu.memory_space<vmem>>, vector<16x384xf32>,
    return
  }
}

</mosaic_0001>

<bundles_post_ra>
// kernel: gcn_forward.1
= control target key start
LH: loop header
LB: loop body
LE: loop exit
PB: predicated region body
PF: predicated region fallthrough
CT: control target
= control target key end

     0   :  { %v949_v1 = vmov 0.0   ;;  %vm950_vm0 = vmmov 0   ;;  %s1192_s0 = inlined_call_operand.vmem [shape: bf16[16,16], index: 0, kind: input, shape index: {}]   ;;  %s1193_s1 = inlined_call_operand.vmem [shape: bf16[16,384], index: 1, kind: input, shape index: {}]   ;;  %s1194_s2 = inlined_call_operand.vmem [shape: bf16[384,128], index: 2, kind: input, shape index: {}]   ;;  %s1195_s3 = inlined_call_operand.vmem [shape: f32[1,128], index: 3, kind: input, shape index: {}]   ;;  %s1196_s4 = inlined_call_operand.vmem [shape: bf16[128,384], index: 4, kind: input, shape index: {}]   ;;  %s1197_s5 = inlined_call_operand.vmem [shape: f32[1,384], index: 5, kind: input, shape index: {}]   ;;  %s1198_s6 = inlined_call_operand.hbm [shape: f32[16,384], index: 6, kind: output, shape index: {}]  }
   0x1   :  { %v864_v0 = vld [vmem:[%s1194_s2 + $0x40] sm:$0xff]   ;;  %806 = vmatprep.subr.bf16.mxu1 %v949_v1  ;;  %822 = vmatprep.mubr.msk.bf16.mxu1 %vm950_vm0, %v949_v1  ;;  %v867_v4 = vld [vmem:[%s1194_s2 + $0x48] sm:$0xff]   ;;  %v870_v7 = vld [vmem:[%s1194_s2 + $0x50] sm:$0xff]  }
   0x2   :  { %v865_v2 = vld [vmem:[%s1194_s2] sm:$0xff]   ;;  %762 = vmatprep.subr.bf16.mxu0 %v864_v0  ;;  %v868_v5 = vld [vmem:[%s1194_s2 + $0x8] sm:$0xff]   ;;  %v871_v8 = vld [vmem:[%s1194_s2 + $0x10] sm:$0xff]  }
   0x3   :  { %v866_v3 = vld [vmem:[%s1194_s2 + $0x80] sm:$0xff]   ;;  %763 = vmatpush3.bf16.msra.mxu0 %v865_v2  ;;  %v869_v6 = vld [vmem:[%s1194_s2 + $0x88] sm:$0xff]   ;;  %v872_v9 = vld [vmem:[%s1194_s2 + $0x90] sm:$0xff]  }
   0x4   :  { %807 = vmatpush3.bf16.msra.mxu1 %v866_v3  ;;  %764 = vmatprep.subr.bf16.mxu0 %v867_v4  ;;  %v873_v10 = vld [vmem:[%s1194_s2 + $0x58] sm:$0xff]   ;;  %v876_v13 = vld [vmem:[%s1194_s2 + $0x60] sm:$0xff]   ;;  %v879_v16 = vld [vmem:[%s1194_s2 + $0x68] sm:$0xff]  }
   0x5   :  { %808 = vmatprep.subr.bf16.mxu1 %v949_v1  ;;  %v874_v11 = vld [vmem:[%s1194_s2 + $0x18] sm:$0xff]   ;;  %v877_v14 = vld [vmem:[%s1194_s2 + $0x20] sm:$0xff]   ;;  %v880_v17 = vld [vmem:[%s1194_s2 + $0x28] sm:$0xff]  }
   0x6   :  { %v875_v12 = vld [vmem:[%s1194_s2 + $0x98] sm:$0xff]   ;;  %v878_v15 = vld [vmem:[%s1194_s2 + $0xa0] sm:$0xff]   ;;  %v881_v18 = vld [vmem:[%s1194_s2 + $0xa8] sm:$0xff]  }
   0x7   :  { %765 = vmatpush3.bf16.msra.mxu0 %v868_v5  ;;  %v882_v19 = vld [vmem:[%s1194_s2 + $0x70] sm:$0xff]   ;;  %v885_v22 = vld [vmem:[%s1194_s2 + $0x78] sm:$0xff]   ;;  %v888_v26 = vld [vmem:[%s1193_s1] ss:$12 sps:$4 sm:$0xff]  }
   0x8   :  { %809 = vmatpush3.bf16.msra.mxu1 %v869_v6  ;;  %766 = vmatprep.subr.bf16.mxu0 %v870_v7  ;;  %v883_v20 = vld [vmem:[%s1194_s2 + $0x30] sm:$0xff]   ;;  %v886_v23 = vld [vmem:[%s1194_s2 + $0x38] sm:$0xff]  }
   0x9   :  { %810 = vmatprep.subr.bf16.mxu1 %v949_v1  ;;  %v884_v21 = vld [vmem:[%s1194_s2 + $0xb0] sm:$0xff]   ;;  %v887_v25 = vld [vmem:[%s1194_s2 + $0xb8] sm:$0xff]  }
   0xa   :  { %v890_v24 = vld [vmem:[%s1193_s1 + $0x4] ss:$12 sps:$4 sm:$0xff]   ;;  %v891_v27 = vld [vmem:[%s1193_s1 + $0x8] ss:$12 sps:$4 sm:$0xff]  }
   0xb   :  { %767 = vmatpush3.bf16.msra.mxu0 %v871_v8  ;;  %271 = vmatprep.mubr.bf16.mxu0 %v890_v24 }
   0xc   :  { %811 = vmatpush3.bf16.msra.mxu1 %v872_v9  ;;  %768 = vmatprep.subr.bf16.mxu0 %v873_v10 }
   0xd   :  { %812 = vmatprep.subr.bf16.mxu1 %v949_v1 }
   0xf   :  { %769 = vmatpush3.bf16.msra.mxu0 %v874_v11 }
  0x10   :  { %813 = vmatpush3.bf16.msra.mxu1 %v875_v12  ;;  %770 = vmatprep.subr.bf16.mxu0 %v876_v13 }
  0x11   :  { %814 = vmatprep.subr.bf16.mxu1 %v949_v1 }
  0x13   :  { %771 = vmatpush3.bf16.msra.mxu0 %v877_v14 }
  0x14   :  { %815 = vmatpush3.bf16.msra.mxu1 %v878_v15  ;;  %772 = vmatprep.subr.bf16.mxu0 %v879_v16 }
  0x15   :  { %816 = vmatprep.subr.bf16.mxu1 %v949_v1 }
  0x17   :  { %773 = vmatpush3.bf16.msra.mxu0 %v880_v17 }
  0x18   :  { %817 = vmatpush3.bf16.msra.mxu1 %v881_v18  ;;  %774 = vmatprep.subr.bf16.mxu0 %v882_v19 }
  0x19   :  { %818 = vmatprep.subr.bf16.mxu1 %v949_v1 }
  0x1b   :  { %775 = vmatpush3.bf16.msra.mxu0 %v883_v20 }
  0x1c   :  { %819 = vmatpush3.bf16.msra.mxu1 %v884_v21  ;;  %776 = vmatprep.subr.bf16.mxu0 %v885_v22 }
  0x1d   :  { %820 = vmatprep.subr.bf16.mxu1 %v949_v1 }
  0x1f   :  { %777 = vmatpush3.bf16.msra.mxu0 %v886_v23 }
  0x20   :  { %821 = vmatpush3.bf16.msra.mxu1 %v887_v25  ;;  %826 = vmatprep.subr.bf16.mxu0 %v949_v1 }
  0x21   :  { %832 = vmatprep.subr.bf16.mxu1 %v949_v1 }
  0x22   :  { %272 = vmatmul.mubr.bf16.vlgmr.msra.gmra.mrb[0].mxu0 %v888_v26 }
  0x23   :  { %823 = vmatmul.mubr.bf16.vlgmr.msra.gmra.mrb[0].mxu1 %v891_v27  ;;  %828 = vmatprep.mubr.msk.bf16.mxu0 %vm950_vm0, %v949_v1 }
  0x24   :  { %834 = vmatprep.mubr.msk.bf16.mxu1 %vm950_vm0, %v949_v1 }
  0x25   :  { %11 = vsyncpa [#allocation3], 0  ;;  %v892_v41 = vld [vmem:[%s1192_s0] sm:$0xff]   ;;  %vm334_vm1 = vcmask 130048   ;;  %v899_v44 = vld [vmem:[%s1196_s4 + $0x1c] ss:$12 sps:$4 sm:$0xff]   ;;  %v458_v18 = vlaneseq }
  0x26   :  { %v893_v42 = vld [vmem:[%s1196_s4] ss:$12 sps:$4 sm:$0xff]   ;;  %v895_v43 = vld [vmem:[%s1196_s4 + $0x4] ss:$12 sps:$4 sm:$0xff]   ;;  %v905_v49 = vld [vmem:[%s1196_s4 + $0x48] ss:$12 sps:$4 sm:$0xff]  }
  0x27   :  { %v897_v45 = vld [vmem:[%s1196_s4 + $0x18] ss:$12 sps:$4 sm:$0xff]   ;;  %v903_v46 = vld [vmem:[%s1196_s4 + $0x34] ss:$12 sps:$4 sm:$0xff]   ;;  %v901_v47 = vld [vmem:[%s1196_s4 + $0x30] ss:$12 sps:$4 sm:$0xff]  }
  0x28   :  { %v907_v48 = vld [vmem:[%s1196_s4 + $0x4c] ss:$12 sps:$4 sm:$0xff]   ;;  %v911_v50 = vld [vmem:[%s1196_s4 + $0x64] ss:$12 sps:$4 sm:$0xff]   ;;  %v915_v52 = vld [vmem:[%s1196_s4 + $0x7c] ss:$12 sps:$4 sm:$0xff]  }
  0x29   :  { %v909_v51 = vld [vmem:[%s1196_s4 + $0x60] ss:$12 sps:$4 sm:$0xff]   ;;  %v913_v53 = vld [vmem:[%s1196_s4 + $0x78] ss:$12 sps:$4 sm:$0xff]   ;;  %v917_v55 = vld [vmem:[%s1196_s4 + $0x90] ss:$12 sps:$4 sm:$0xff]  }
  0x2a   :  { %v919_v54 = vld [vmem:[%s1196_s4 + $0x94] ss:$12 sps:$4 sm:$0xff]   ;;  %v904_v5 = vld [vmem:[%s1196_s4 + $0x38] ss:$12 sps:$4 sm:$0xff]   ;;  %v908_v6 = vld [vmem:[%s1196_s4 + $0x50] ss:$12 sps:$4 sm:$0xff]  }
  0x2b   :  { %v734_v56 = vld [vmem:[%s1195_s3] ss:$0 sm:$0xff]  ;;  %v896_v3 = vld [vmem:[%s1196_s4 + $0x8] ss:$12 sps:$4 sm:$0xff]   ;;  %v920_v9 = vld [vmem:[%s1196_s4 + $0x98] ss:$12 sps:$4 sm:$0xff]  }
  0x2c   :  { %v900_v4 = vld [vmem:[%s1196_s4 + $0x20] ss:$12 sps:$4 sm:$0xff]   ;;  %v912_v7 = vld [vmem:[%s1196_s4 + $0x68] ss:$12 sps:$4 sm:$0xff]   ;;  %v924_v12 = vld [vmem:[%s1196_s4 + $0xb0] ss:$12 sps:$4 sm:$0xff]  }
  0x2d   :  { %v916_v8 = vld [vmem:[%s1196_s4 + $0x80] ss:$12 sps:$4 sm:$0xff]   ;;  %v921_v11 = vld [vmem:[%s1196_s4 + $0xa8] ss:$12 sps:$4 sm:$0xff]   ;;  %v951_v13 = vmov 0   ;;  %v459_v19 = vshrl.u32 %v458_v18, 7 }
  0x2e   :  { %v923_v10 = vld [vmem:[%s1196_s4 + $0xac] ss:$12 sps:$4 sm:$0xff]   ;;  %v456_v22 = vld [vmem:[%s1197_s5] sm:$0x7]  ;;  %s952_s4 = smov [#allocation2]  }
  0x2f   :  { %v460_v20 = vsub.s32 0, %v459_v19  ;;  %v468_v21 = vsub.s32 2, %v459_v19  ;;  %v464_v23 = vsub.s32 1, %v459_v19  ;;  %s696_s26 = sshll.u32 %s952_s4, 4  ;;  %s697_s26 = int_to_ptr.vmem [resolvable:$true] %s696_s26 }
  0x30   :  { %s925_s5 = scalar_lea.vmem %s697_s26, 768  ;;  %p930_p1 = scmp.lt.s32.totalorder %s697_s26, %s697_s26 }
  0x31   :  { %v461_v24 = vrot.slane %v456_v22, %v460_v20  ;;  %v469_v25 = vrot.slane %v456_v22, %v468_v21  ;;  %v465_v26 = vrot.slane %v456_v22, %v464_v23  ;;  %p926_p0 = scmp.ne.s32.totalorder %s697_s26, %s925_s5  ;;  %p931_p2 = scmp.lt.s32.totalorder %s925_s5, %s925_s5 }
  0x33   :  { %p932_p3 = por %p931_p2, %p930_p1 }
  0x35   :  { %p933_p4 = pnand %p932_p3, %p926_p0 }
  0xf5   :  { %v778_v28 = vpop.f32.mrb[0].mxu0 }
  0xf6   :  { %v314_v29 = vpop.f32.mrb[0].mxu1  ;;  %v779_v30 = vpop.f32.mrb[1].mxu0 }
  0xf7   :  { %v780_v31 = vadd.f32 %v779_v30, %v778_v28  ;;  %v824_v32 = vpop.f32.mrb[1].mxu1  ;;  %v781_v33 = vpop.f32.mrb[2].mxu0 }
  0xf8   :  { %v317_v34 = vpop.f32.mrb[2].mxu1  ;;  %v782_v35 = vpop.f32.mrb[3].mxu0 }
  0xf9   :  { %v315_v36 = vadd.f32 %v780_v31, %v314_v29  ;;  %v783_v37 = vadd.f32 %v782_v35, %v781_v33  ;;  %v825_v38 = vpop.f32.mrb[3].mxu1 }
  0xfb   :  { %v318_v39 = vadd.f32 %v783_v37, %v317_v34 }
  0xfd   :  { %v321_v40 = vpack.c.bf16 %v318_v39, %v315_v36 }
  0xff   :  { %827 = vmatpush3.bf16.msra.mxu0 %v321_v40 }
 0x100   :  { %601 = vmatprep.subr.bf16.mxu0 %v895_v43 }
 0x102   :  { %829 = vmatmul.mubr.msk.bf16.vlgmr.msra.gmra.mrb[4].mxu0 %vm334_vm1, %v892_v41 }
 0x103   :  { %602 = vmatpush1.bf16.msra.mxu0 %v893_v42  ;;  %633 = vmatprep.mubr.bf16.mxu0 %v951_v13 }
 0x104   :  { %603 = vmatprep.subr.bf16.mxu0 %v899_v44 }
 0x107   :  { %604 = vmatpush1.bf16.msra.mxu0 %v897_v45 }
 0x108   :  { %605 = vmatprep.subr.bf16.mxu0 %v903_v46 }
 0x10b   :  { %606 = vmatpush1.bf16.msra.mxu0 %v901_v47 }
 0x10c   :  { %607 = vmatprep.subr.bf16.mxu0 %v907_v48 }
 0x10f   :  { %608 = vmatpush1.bf16.msra.mxu0 %v905_v49 }
 0x110   :  { %609 = vmatprep.subr.bf16.mxu0 %v911_v50 }
 0x113   :  { %610 = vmatpush1.bf16.msra.mxu0 %v909_v51 }
 0x114   :  { %611 = vmatprep.subr.bf16.mxu0 %v915_v52 }
 0x117   :  { %612 = vmatpush1.bf16.msra.mxu0 %v913_v53 }
 0x118   :  { %613 = vmatprep.subr.bf16.mxu0 %v919_v54 }
 0x11b   :  { %614 = vmatpush1.bf16.msra.mxu0 %v917_v55 }
 0x11c   :  { %615 = vmatprep.subr.bf16.mxu0 %v923_v10 }
 0x11f   :  { %616 = vmatpush1.bf16.msra.mxu0 %v921_v11 }
 0x1d5   :  { %v372_v57 = vpop.f32.mrb[4].mxu0 }
 0x1d6   :  { %v373_v58 = vadd.f32 %v734_v56, %v372_v57  ;;  %v830_v59 = vpop.f32.mrb[5].mxu0 }
 0x1d7   :  { %v375_v60 = vpop.f32.mrb[6].mxu0 }
 0x1d8   :  { %v376_v61 = vadd.f32 %v734_v56, %v375_v60  ;;  %v831_v62 = vpop.f32.mrb[7].mxu0  ;;  %v379_v63 = vmax.f32 %v373_v58, 0.0 }
 0x1da   :  { %v380_v0 = vmax.f32 %v376_v61, 0.0 }
 0x1dc   :  { %v381_v2 = vpack.c.bf16 %v380_v0, %v379_v63 }
 0x1de   :  { %833 = vmatpush3.bf16.msra.mxu1 %v381_v2 }
 0x1df   :  { %838 = vmatprep.subr.bf16.mxu1 %v949_v1 }
 0x1e1   :  { %835 = vmatmul.mubr.msk.bf16.vlgmr.msra.gmra.mrb[4].mxu1 %vm334_vm1, %v892_v41 }
 0x1e2   :  { %839 = vmatpush3.bf16.msra.mxu1 %v896_v3  ;;  %854 = vmatprep.mubr.msk.bf16.mxu1 %vm950_vm0, %v949_v1 }
 0x1e3   :  { %840 = vmatprep.subr.bf16.mxu1 %v949_v1 }
 0x1e6   :  { %841 = vmatpush3.bf16.msra.mxu1 %v900_v4 }
 0x1e7   :  { %842 = vmatprep.subr.bf16.mxu1 %v949_v1 }
 0x1ea   :  { %843 = vmatpush3.bf16.msra.mxu1 %v904_v5 }
 0x1eb   :  { %844 = vmatprep.subr.bf16.mxu1 %v949_v1 }
 0x1ee   :  { %845 = vmatpush3.bf16.msra.mxu1 %v908_v6 }
 0x1ef   :  { %846 = vmatprep.subr.bf16.mxu1 %v949_v1 }
 0x1f2   :  { %847 = vmatpush3.bf16.msra.mxu1 %v912_v7 }
 0x1f3   :  { %848 = vmatprep.subr.bf16.mxu1 %v949_v1 }
 0x1f6   :  { %849 = vmatpush3.bf16.msra.mxu1 %v916_v8 }
 0x1f7   :  { %850 = vmatprep.subr.bf16.mxu1 %v949_v1 }
 0x1fa   :  { %851 = vmatpush3.bf16.msra.mxu1 %v920_v9 }
 0x1fb   :  { %852 = vmatprep.subr.bf16.mxu1 %v949_v1 }
 0x1fe   :  { %853 = vmatpush3.bf16.msra.mxu1 %v924_v12 }
 0x2b4   :  { %v416_v14 = vpop.f32.mrb[4].mxu1 }
 0x2b5   :  { %v836_v15 = vpop.f32.mrb[5].mxu1 }
 0x2b6   :  { %v419_v1 = vpop.f32.mrb[6].mxu1 }
 0x2b7   :  { %v423_v16 = vpack.c.bf16 %v419_v1, %v416_v14  ;;  %v837_v17 = vpop.f32.mrb[7].mxu1 }
 0x2b9   :  { %634 = vmatmul.mubr.bf16.vlgmr.msra.gmra.mrb[8].mxu0 %v423_v16  ;;  %855 = vmatmul.mubr.bf16.vlgmr.msra.gmra.mrb[8].mxu1 %v423_v16 }
 0x38c   :  { %v635_v27 = vpop.f32.mrb[8].mxu0  ;;  %v678_v28 = vpop.f32.mrb[8].mxu1 }
 0x38d   :  { %v636_v29 = vadd.f32 %v635_v27, %v461_v24  ;;  %v679_v30 = vadd.f32 %v678_v28, %v469_v25  ;;  %v637_v31 = vpop.f32.mrb[9].mxu0  ;;  %v856_v32 = vpop.f32.mrb[9].mxu1 }
 0x38e   :  { %v638_v33 = vadd.f32 %v637_v31, %v465_v26  ;;  %v639_v34 = vpop.f32.mrb[10].mxu0  ;;  %v681_v35 = vpop.f32.mrb[10].mxu1 }
 0x38f   :  { %685 = vst [vmem:[#allocation2] sm:$0xff] %v636_v29  ;;  %687 = vst [vmem:[#allocation2 + $0x10] sm:$0xff] %v679_v30  ;;  %v640_v36 = vadd.f32 %v639_v34, %v461_v24  ;;  %v682_v37 = vadd.f32 %v681_v35, %v469_v25  ;;  %v641_v38 = vpop.f32.mrb[11].mxu0  ;;  %v857_v39 = vpop.f32.mrb[11].mxu1 }
 0x390   :  { %686 = vst [vmem:[#allocation2 + $0x8] sm:$0xff] %v638_v33  ;;  %v642_v40 = vadd.f32 %v641_v38, %v465_v26 }
 0x391   :  { %688 = vst [vmem:[#allocation2 + $0x18] sm:$0xff] %v640_v36  ;;  %690 = vst [vmem:[#allocation2 + $0x28] sm:$0xff] %v682_v37 }
 0x392   :  { %689 = vst [vmem:[#allocation2 + $0x20] sm:$0xff] %v642_v40 }
 0x393   :  { %936 = shalt.err (!%p933_p4)
}
 0x394   :  { %s937_s27 = scalar_lea.hbm %s1198_s6, 768 }
 0x395   :  { %p938_p5 = scmp.ne.s32.totalorder %s1198_s6, %s937_s27  ;;  %p941_p6 = scmp.lt.u32.totalorder %s937_s27, %s1198_s6 }
 0x397   :  { %p943_p7 = pnand %p941_p6, %p938_p5 }
 0x399   :  { %946 = shalt.err (!%p943_p7)
}
 0x39a   :  { %s953_s3 = smov 384   ;;  %s954_s8 = smov 24  }
 0x39b   :  { %702 = dma.vmem_to_hbm [thread:$0]  %s697_s26, 768, %s1198_s6, [#allocation3], %s953_s3, %s953_s3, %s954_s8  }
 0x39c   :  { %947 = dma.done.wait [#allocation3], 768  }
 0x39d   :  { %948 = vsyncadd [#allocation3], 4294966528 }
 0x39e   :  { %706 = vsyncpa [#allocation3], 1 }

</bundles_post_ra>
